<compile_context>
chip_gen: v7x
topology: tpu7x:2x2x1
jax: 0.10.0
libtpu: 0.0.40
codegen_flags: <defaults>
</compile_context>

<pallas_src>
import jax
import jax.numpy as jnp
import numpy as np
from jax import lax
from jax.experimental import pallas as pl
from jax.experimental.pallas import tpu as pltpu


# ----------------------------- Pallas kernel -------------------------------

def recurrent_decoder_kernel(h0_ref, wbig_ref, bbig_ref, wden_ref, bden_ref,
                             out_ref, h_scr):
    B, H = h0_ref.shape
    T = h_scr.shape[0] // B

    # Hoist loop-invariant weight/bias loads out of the recurrence.
    W = wbig_ref[...]        # (H, 4H)   [ W_rz | W_xn | W_hn ]
    bias = bbig_ref[...]     # (1, 4H)   [ b_rz | b_xn | b_hn ]

    def step(i, h):
        # One fused matmul per step: gates = h @ W + b, (B, 4H).
        g = jnp.dot(h, W, preferred_element_type=jnp.float32) + bias
        rz = jax.nn.sigmoid(g[:, :2 * H])            # r || z in one EUP slab
        r = rz[:, :H]
        z = rz[:, H:]
        # n = tanh(i_n + r * h_n): input- and hidden-side n kept separate
        # because r gates only the hidden-side projection (PyTorch semantics).
        n = jnp.tanh(g[:, 2 * H:3 * H] + r * g[:, 3 * H:])
        h_new = (1.0 - z) * n + z * h
        start = pl.multiple_of(i * B, B)
        h_scr[pl.ds(start, B), :] = h_new
        return h_new

    lax.fori_loop(0, T, step, h0_ref[...], unroll=True)

    # Batched output dense over all T*B hidden states, single store.
    out = (jnp.dot(h_scr[...], wden_ref[...], preferred_element_type=jnp.float32)
           + bden_ref[...])
    out_ref[...] = out


# ------------------------------ JAX wrapper ---------------------------------

def recurrent_decoder_forward(h_0, seq_len, params):
    """h_0: (1, B, H) or (B, H) float32 -> (B, seq_len, F) float32."""
    h0 = h_0.reshape(h_0.shape[-2], h_0.shape[-1])
    B, H = h0.shape
    T = int(seq_len)

    wih, whh = params["wih"], params["whh"]          # (F, 3H), (H, 3H)
    bih, bhh = params["bih"], params["bhh"]          # (1, 3H), (1, 3H)
    wden, bden = params["wden"], params["bden"]      # (H, F),  (1, F)
    F = wden.shape[1]

    # Fold the dense layer into the GRU input projection (exact algebra,
    # done once in the wrapper as plain XLA).
    W_x = wden @ wih                                  # (H, 3H)
    b_x = bden @ wih + bih                            # (1, 3H)
    W_rz = W_x[:, :2 * H] + whh[:, :2 * H]            # r/z merge fully
    b_rz = b_x[:, :2 * H] + bhh[:, :2 * H]
    W_big = jnp.concatenate([W_rz, W_x[:, 2 * H:], whh[:, 2 * H:]], axis=1)  # (H, 4H)
    b_big = jnp.concatenate([b_rz, b_x[:, 2 * H:], bhh[:, 2 * H:]], axis=1)  # (1, 4H)

    vmem = pl.BlockSpec(memory_space=pltpu.MemorySpace.VMEM)
    out_flat = pl.pallas_call(
        recurrent_decoder_kernel,
        out_shape=jax.ShapeDtypeStruct((T * B, F), jnp.float32),
        in_specs=[vmem] * 5,
        out_specs=vmem,
        scratch_shapes=[pltpu.VMEM((T * B, H), jnp.float32)],
    )(h0, W_big, b_big, wden, bden)

    # row t*B + b holds dense(h_{t+1})[b]  ->  (B, T, F) batch-first output.
    return jnp.transpose(out_flat.reshape(T, B, F), (1, 0, 2))


def init_params(key, n_features, latent_dim):
    """Uniform +/- 1/sqrt(H) init, PyTorch-style. Weights stored pre-transposed
    for right-multiplication, gate blocks concatenated along the last axis in
    PyTorch GRU order (r, z, n)."""
    F, H = n_features, latent_dim
    ks = jax.random.split(key, 6)
    s = 1.0 / np.sqrt(H)
    u = lambda k, shape: jax.random.uniform(k, shape, jnp.float32, -s, s)
    return dict(
        wih=u(ks[0], (F, 3 * H)), whh=u(ks[1], (H, 3 * H)),
        bih=u(ks[2], (1, 3 * H)), bhh=u(ks[3], (1, 3 * H)),
        wden=u(ks[4], (H, F)), bden=u(ks[5], (1, F)),
    )


# --------------------------- pure-JAX reference ------------------------------

def reference_forward(h_0, seq_len, p):
    """Literal translation of RecurrentDecoder.forward (unfused weights)."""
    h = h_0.reshape(h_0.shape[-2], h_0.shape[-1])     # h_0.squeeze()
    H = p["whh"].shape[0]
    x = h @ p["wden"] + p["bden"]
    outs = []
    for _ in range(seq_len):
        gx = x @ p["wih"] + p["bih"]                  # (B, 3H)
        gh = h @ p["whh"] + p["bhh"]                  # (B, 3H)
        r = jax.nn.sigmoid(gx[:, :H] + gh[:, :H])
        z = jax.nn.sigmoid(gx[:, H:2 * H] + gh[:, H:2 * H])
        n = jnp.tanh(gx[:, 2 * H:] + r * gh[:, 2 * H:])
        h = (1.0 - z) * n + z * h
        x = h @ p["wden"] + p["bden"]
        outs.append(x)
    return jnp.stack(outs, axis=1)                    # (B, seq_len, F)


# ---------------------------------- main -------------------------------------

if __name__ == "__main__":
    B, T, F, H = 8, 8, 8, 32   # batch, seq_len, n_features, latent_dim

    key = jax.random.PRNGKey(0)
    k_h, k_p = jax.random.split(key)
    h_0 = jax.random.normal(k_h, (1, B, H), jnp.float32)   # GRU final hidden (1, B, H)
    params = init_params(k_p, F, H)

    out = recurrent_decoder_forward(h_0, T, params)
    out = jax.block_until_ready(out)

    ref = jax.block_until_ready(reference_forward(h_0, T, params))
    assert out.shape == (B, T, F)
    np.testing.assert_allclose(np.asarray(out), np.asarray(ref),
                               rtol=1e-4, atol=1e-4)

    print("KERNEL_OK")
</pallas_src>

<mosaic_0001>
module attributes {stable_mosaic.version = 11 : i64} {
  func.func @recurrent_decoder_kernel(%arg0: memref<8x32xf32, #tpu.memory_space<vmem>>, %arg1: memref<32x128xf32, #tpu.memory_space<vmem>>, %arg2: memref<1x128xf32, #tpu.memory_space<vmem>>, %arg3: memref<32x8xf32, #tpu.memory_space<vmem>>, %arg4: memref<1x8xf32, #tpu.memory_space<vmem>>, %arg5: memref<64x8xf32, #tpu.memory_space<vmem>>, %arg6: memref<64x32xf32, #tpu.memory_space<vmem>>) attributes {dimension_semantics = [], scalar_prefetch = 0 : i64, scratch_operands = 1 : i64, tpu.core_type = #tpu.core_type<tc>} {
    %c0 = arith.constant 0 : index
    %c0_0 = arith.constant 0 : index
    %0 = vector.load %arg1[%c0, %c0_0] : memref<32x128xf32, #tpu.memory_space<vmem>>, vector<32x128xf32>
    %c0_1 = arith.constant 0 : index
    %c0_2 = arith.constant 0 : index
    %1 = vector.load %arg2[%c0_1, %c0_2] : memref<1x128xf32, #tpu.memory_space<vmem>>, vector<1x128xf32>
    %c0_3 = arith.constant 0 : index
    %c0_4 = arith.constant 0 : index
    %2 = vector.load %arg0[%c0_3, %c0_4] : memref<8x32xf32, #tpu.memory_space<vmem>>, vector<8x32xf32>
    %c0_i32 = arith.constant 0 : i32
    %cst = arith.constant dense<0.000000e+00> : vector<8x128xf32>
    %3 = tpu.matmul %2, %0, %cst {dimension_numbers = #tpu.dot_dimension_numbers<[1], [0], [0], [1], [0, 0, 1, 1], [], []>} : vector<8x32xf32>, vector<32x128xf32>, vector<8x128xf32> -> vector<8x128xf32>
    %4 = vector.broadcast %1 : vector<1x128xf32> to vector<8x128xf32>
    %5 = arith.addf %3, %4 : vector<8x128xf32>
    %6 = vector.extract_strided_slice %5 {offsets = [0, 0], sizes = [8, 64], strides = [1, 1]} : vector<8x128xf32> to vector<8x64xf32>
    %7 = arith.negf %6 : vector<8x64xf32>
    %8 = math.exp %7 : vector<8x64xf32>
    %cst_5 = arith.constant 1.000000e+00 : f32
    %9 = vector.broadcast %cst_5 : f32 to vector<8x64xf32>
    %10 = arith.addf %9, %8 : vector<8x64xf32>
    %11 = arith.divf %9, %10 : vector<8x64xf32>
    %12 = vector.extract_strided_slice %11 {offsets = [0, 0], sizes = [8, 32], strides = [1, 1]} : vector<8x64xf32> to vector<8x32xf32>
    %13 = vector.extract_strided_slice %11 {offsets = [0, 32], sizes = [8, 32], strides = [1, 1]} : vector<8x64xf32> to vector<8x32xf32>
    %14 = vector.extract_strided_slice %5 {offsets = [0, 64], sizes = [8, 32], strides = [1, 1]} : vector<8x128xf32> to vector<8x32xf32>
    %15 = vector.extract_strided_slice %5 {offsets = [0, 96], sizes = [8, 32], strides = [1, 1]} : vector<8x128xf32> to vector<8x32xf32>
    %16 = arith.mulf %12, %15 : vector<8x32xf32>
    %17 = arith.addf %14, %16 : vector<8x32xf32>
    %18 = math.tanh %17 : vector<8x32xf32>
    %cst_6 = arith.constant 1.000000e+00 : f32
    %19 = vector.broadcast %cst_6 : f32 to vector<8x32xf32>
    %20 = arith.subf %19, %13 : vector<8x32xf32>
    %21 = arith.mulf %20, %18 : vector<8x32xf32>
    %22 = arith.mulf %13, %2 : vector<8x32xf32>
    %23 = arith.addf %21, %22 : vector<8x32xf32>
    %c8_i32 = arith.constant 8 : i32
    %24 = arith.muli %c0_i32, %c8_i32 : i32
    %25 = tpu.assume_multiple %24, 8 : i32
    %26 = arith.index_cast %25 : i32 to index
    %c0_7 = arith.constant 0 : index
    %27 = vector.load %arg6[%26, %c0_7] : memref<64x32xf32, #tpu.memory_space<vmem>>, vector<8x32xf32>
    tpu.vector_store %arg6[%26, %c0_7], %23 {strides = array<i32>} : memref<64x32xf32, #tpu.memory_space<vmem>>, vector<8x32xf32>,
    %c1_i32 = arith.constant 1 : i32
    %cst_8 = arith.constant dense<0.000000e+00> : vector<8x128xf32>
    %28 = tpu.matmul %23, %0, %cst_8 {dimension_numbers = #tpu.dot_dimension_numbers<[1], [0], [0], [1], [0, 0, 1, 1], [], []>} : vector<8x32xf32>, vector<32x128xf32>, vector<8x128xf32> -> vector<8x128xf32>
    %29 = vector.broadcast %1 : vector<1x128xf32> to vector<8x128xf32>
    %30 = arith.addf %28, %29 : vector<8x128xf32>
    %31 = vector.extract_strided_slice %30 {offsets = [0, 0], sizes = [8, 64], strides = [1, 1]} : vector<8x128xf32> to vector<8x64xf32>
    %32 = arith.negf %31 : vector<8x64xf32>
    %33 = math.exp %32 : vector<8x64xf32>
    %cst_9 = arith.constant 1.000000e+00 : f32
    %34 = vector.broadcast %cst_9 : f32 to vector<8x64xf32>
    %35 = arith.addf %34, %33 : vector<8x64xf32>
    %36 = arith.divf %34, %35 : vector<8x64xf32>
    %37 = vector.extract_strided_slice %36 {offsets = [0, 0], sizes = [8, 32], strides = [1, 1]} : vector<8x64xf32> to vector<8x32xf32>
    %38 = vector.extract_strided_slice %36 {offsets = [0, 32], sizes = [8, 32], strides = [1, 1]} : vector<8x64xf32> to vector<8x32xf32>
    %39 = vector.extract_strided_slice %30 {offsets = [0, 64], sizes = [8, 32], strides = [1, 1]} : vector<8x128xf32> to vector<8x32xf32>
    %40 = vector.extract_strided_slice %30 {offsets = [0, 96], sizes = [8, 32], strides = [1, 1]} : vector<8x128xf32> to vector<8x32xf32>
    %41 = arith.mulf %37, %40 : vector<8x32xf32>
    %42 = arith.addf %39, %41 : vector<8x32xf32>
    %43 = math.tanh %42 : vector<8x32xf32>
    %cst_10 = arith.constant 1.000000e+00 : f32
    %44 = vector.broadcast %cst_10 : f32 to vector<8x32xf32>
    %45 = arith.subf %44, %38 : vector<8x32xf32>
    %46 = arith.mulf %45, %43 : vector<8x32xf32>
    %47 = arith.mulf %38, %23 : vector<8x32xf32>
    %48 = arith.addf %46, %47 : vector<8x32xf32>
    %c8_i32_11 = arith.constant 8 : i32
    %49 = arith.muli %c1_i32, %c8_i32_11 : i32
    %50 = tpu.assume_multiple %49, 8 : i32
    %51 = arith.index_cast %50 : i32 to index
    %c0_12 = arith.constant 0 : index
    %52 = vector.load %arg6[%51, %c0_12] : memref<64x32xf32, #tpu.memory_space<vmem>>, vector<8x32xf32>
    tpu.vector_store %arg6[%51, %c0_12], %48 {strides = array<i32>} : memref<64x32xf32, #tpu.memory_space<vmem>>, vector<8x32xf32>,
    %c2_i32 = arith.constant 2 : i32
    %cst_13 = arith.constant dense<0.000000e+00> : vector<8x128xf32>
    %53 = tpu.matmul %48, %0, %cst_13 {dimension_numbers = #tpu.dot_dimension_numbers<[1], [0], [0], [1], [0, 0, 1, 1], [], []>} : vector<8x32xf32>, vector<32x128xf32>, vector<8x128xf32> -> vector<8x128xf32>
    %54 = vector.broadcast %1 : vector<1x128xf32> to vector<8x128xf32>
    %55 = arith.addf %53, %54 : vector<8x128xf32>
    %56 = vector.extract_strided_slice %55 {offsets = [0, 0], sizes = [8, 64], strides = [1, 1]} : vector<8x128xf32> to vector<8x64xf32>
    %57 = arith.negf %56 : vector<8x64xf32>
    %58 = math.exp %57 : vector<8x64xf32>
    %cst_14 = arith.constant 1.000000e+00 : f32
    %59 = vector.broadcast %cst_14 : f32 to vector<8x64xf32>
    %60 = arith.addf %59, %58 : vector<8x64xf32>
    %61 = arith.divf %59, %60 : vector<8x64xf32>
    %62 = vector.extract_strided_slice %61 {offsets = [0, 0], sizes = [8, 32], strides = [1, 1]} : vector<8x64xf32> to vector<8x32xf32>
    %63 = vector.extract_strided_slice %61 {offsets = [0, 32], sizes = [8, 32], strides = [1, 1]} : vector<8x64xf32> to vector<8x32xf32>
    %64 = vector.extract_strided_slice %55 {offsets = [0, 64], sizes = [8, 32], strides = [1, 1]} : vector<8x128xf32> to vector<8x32xf32>
    %65 = vector.extract_strided_slice %55 {offsets = [0, 96], sizes = [8, 32], strides = [1, 1]} : vector<8x128xf32> to vector<8x32xf32>
    %66 = arith.mulf %62, %65 : vector<8x32xf32>
    %67 = arith.addf %64, %66 : vector<8x32xf32>
    %68 = math.tanh %67 : vector<8x32xf32>
    %cst_15 = arith.constant 1.000000e+00 : f32
    %69 = vector.broadcast %cst_15 : f32 to vector<8x32xf32>
    %70 = arith.subf %69, %63 : vector<8x32xf32>
    %71 = arith.mulf %70, %68 : vector<8x32xf32>
    %72 = arith.mulf %63, %48 : vector<8x32xf32>
    %73 = arith.addf %71, %72 : vector<8x32xf32>
    %c8_i32_16 = arith.constant 8 : i32
    %74 = arith.muli %c2_i32, %c8_i32_16 : i32
    %75 = tpu.assume_multiple %74, 8 : i32
    %76 = arith.index_cast %75 : i32 to index
    %c0_17 = arith.constant 0 : index
    %77 = vector.load %arg6[%76, %c0_17] : memref<64x32xf32, #tpu.memory_space<vmem>>, vector<8x32xf32>
    tpu.vector_store %arg6[%76, %c0_17], %73 {strides = array<i32>} : memref<64x32xf32, #tpu.memory_space<vmem>>, vector<8x32xf32>,
    %c3_i32 = arith.constant 3 : i32
    %cst_18 = arith.constant dense<0.000000e+00> : vector<8x128xf32>
    %78 = tpu.matmul %73, %0, %cst_18 {dimension_numbers = #tpu.dot_dimension_numbers<[1], [0], [0], [1], [0, 0, 1, 1], [], []>} : vector<8x32xf32>, vector<32x128xf32>, vector<8x128xf32> -> vector<8x128xf32>
    %79 = vector.broadcast %1 : vector<1x128xf32> to vector<8x128xf32>
    %80 = arith.addf %78, %79 : vector<8x128xf32>
    %81 = vector.extract_strided_slice %80 {offsets = [0, 0], sizes = [8, 64], strides = [1, 1]} : vector<8x128xf32> to vector<8x64xf32>
    %82 = arith.negf %81 : vector<8x64xf32>
    %83 = math.exp %82 : vector<8x64xf32>
    %cst_19 = arith.constant 1.000000e+00 : f32
    %84 = vector.broadcast %cst_19 : f32 to vector<8x64xf32>
    %85 = arith.addf %84, %83 : vector<8x64xf32>
    %86 = arith.divf %84, %85 : vector<8x64xf32>
    %87 = vector.extract_strided_slice %86 {offsets = [0, 0], sizes = [8, 32], strides = [1, 1]} : vector<8x64xf32> to vector<8x32xf32>
    %88 = vector.extract_strided_slice %86 {offsets = [0, 32], sizes = [8, 32], strides = [1, 1]} : vector<8x64xf32> to vector<8x32xf32>
    %89 = vector.extract_strided_slice %80 {offsets = [0, 64], sizes = [8, 32], strides = [1, 1]} : vector<8x128xf32> to vector<8x32xf32>
    %90 = vector.extract_strided_slice %80 {offsets = [0, 96], sizes = [8, 32], strides = [1, 1]} : vector<8x128xf32> to vector<8x32xf32>
    %91 = arith.mulf %87, %90 : vector<8x32xf32>
    %92 = arith.addf %89, %91 : vector<8x32xf32>
    %93 = math.tanh %92 : vector<8x32xf32>
    %cst_20 = arith.constant 1.000000e+00 : f32
    %94 = vector.broadcast %cst_20 : f32 to vector<8x32xf32>
    %95 = arith.subf %94, %88 : vector<8x32xf32>
    %96 = arith.mulf %95, %93 : vector<8x32xf32>
    %97 = arith.mulf %88, %73 : vector<8x32xf32>
    %98 = arith.addf %96, %97 : vector<8x32xf32>
    %c8_i32_21 = arith.constant 8 : i32
    %99 = arith.muli %c3_i32, %c8_i32_21 : i32
    %100 = tpu.assume_multiple %99, 8 : i32
    %101 = arith.index_cast %100 : i32 to index
    %c0_22 = arith.constant 0 : index
    %102 = vector.load %arg6[%101, %c0_22] : memref<64x32xf32, #tpu.memory_space<vmem>>, vector<8x32xf32>
    tpu.vector_store %arg6[%101, %c0_22], %98 {strides = array<i32>} : memref<64x32xf32, #tpu.memory_space<vmem>>, vector<8x32xf32>,
    %c4_i32 = arith.constant 4 : i32
    %cst_23 = arith.constant dense<0.000000e+00> : vector<8x128xf32>
    %103 = tpu.matmul %98, %0, %cst_23 {dimension_numbers = #tpu.dot_dimension_numbers<[1], [0], [0], [1], [0, 0, 1, 1], [], []>} : vector<8x32xf32>, vector<32x128xf32>, vector<8x128xf32> -> vector<8x128xf32>
    %104 = vector.broadcast %1 : vector<1x128xf32> to vector<8x128xf32>
    %105 = arith.addf %103, %104 : vector<8x128xf32>
    %106 = vector.extract_strided_slice %105 {offsets = [0, 0], sizes = [8, 64], strides = [1, 1]} : vector<8x128xf32> to vector<8x64xf32>
    %107 = arith.negf %106 : vector<8x64xf32>
    %108 = math.exp %107 : vector<8x64xf32>
    %cst_24 = arith.constant 1.000000e+00 : f32
    %109 = vector.broadcast %cst_24 : f32 to vector<8x64xf32>
    %110 = arith.addf %109, %108 : vector<8x64xf32>
    %111 = arith.divf %109, %110 : vector<8x64xf32>
    %112 = vector.extract_strided_slice %111 {offsets = [0, 0], sizes = [8, 32], strides = [1, 1]} : vector<8x64xf32> to vector<8x32xf32>
    %113 = vector.extract_strided_slice %111 {offsets = [0, 32], sizes = [8, 32], strides = [1, 1]} : vector<8x64xf32> to vector<8x32xf32>
    %114 = vector.extract_strided_slice %105 {offsets = [0, 64], sizes = [8, 32], strides = [1, 1]} : vector<8x128xf32> to vector<8x32xf32>
    %115 = vector.extract_strided_slice %105 {offsets = [0, 96], sizes = [8, 32], strides = [1, 1]} : vector<8x128xf32> to vector<8x32xf32>
    %116 = arith.mulf %112, %115 : vector<8x32xf32>
    %117 = arith.addf %114, %116 : vector<8x32xf32>
    %118 = math.tanh %117 : vector<8x32xf32>
    %cst_25 = arith.constant 1.000000e+00 : f32
    %119 = vector.broadcast %cst_25 : f32 to vector<8x32xf32>
    %120 = arith.subf %119, %113 : vector<8x32xf32>
    %121 = arith.mulf %120, %118 : vector<8x32xf32>
    %122 = arith.mulf %113, %98 : vector<8x32xf32>
    %123 = arith.addf %121, %122 : vector<8x32xf32>
    %c8_i32_26 = arith.constant 8 : i32
    %124 = arith.muli %c4_i32, %c8_i32_26 : i32
    %125 = tpu.assume_multiple %124, 8 : i32
    %126 = arith.index_cast %125 : i32 to index
    %c0_27 = arith.constant 0 : index
    %127 = vector.load %arg6[%126, %c0_27] : memref<64x32xf32, #tpu.memory_space<vmem>>, vector<8x32xf32>
    tpu.vector_store %arg6[%126, %c0_27], %123 {strides = array<i32>} : memref<64x32xf32, #tpu.memory_space<vmem>>, vector<8x32xf32>,
    %c5_i32 = arith.constant 5 : i32
    %cst_28 = arith.constant dense<0.000000e+00> : vector<8x128xf32>
    %128 = tpu.matmul %123, %0, %cst_28 {dimension_numbers = #tpu.dot_dimension_numbers<[1], [0], [0], [1], [0, 0, 1, 1], [], []>} : vector<8x32xf32>, vector<32x128xf32>, vector<8x128xf32> -> vector<8x128xf32>
    %129 = vector.broadcast %1 : vector<1x128xf32> to vector<8x128xf32>
    %130 = arith.addf %128, %129 : vector<8x128xf32>
    %131 = vector.extract_strided_slice %130 {offsets = [0, 0], sizes = [8, 64], strides = [1, 1]} : vector<8x128xf32> to vector<8x64xf32>
    %132 = arith.negf %131 : vector<8x64xf32>
    %133 = math.exp %132 : vector<8x64xf32>
    %cst_29 = arith.constant 1.000000e+00 : f32
    %134 = vector.broadcast %cst_29 : f32 to vector<8x64xf32>
    %135 = arith.addf %134, %133 : vector<8x64xf32>
    %136 = arith.divf %134, %135 : vector<8x64xf32>
    %137 = vector.extract_strided_slice %136 {offsets = [0, 0], sizes = [8, 32], strides = [1, 1]} : vector<8x64xf32> to vector<8x32xf32>
    %138 = vector.extract_strided_slice %136 {offsets = [0, 32], sizes = [8, 32], strides = [1, 1]} : vector<8x64xf32> to vector<8x32xf32>
    %139 = vector.extract_strided_slice %130 {offsets = [0, 64], sizes = [8, 32], strides = [1, 1]} : vector<8x128xf32> to vector<8x32xf32>
    %140 = vector.extract_strided_slice %130 {offsets = [0, 96], sizes = [8, 32], strides = [1, 1]} : vector<8x128xf32> to vector<8x32xf32>
    %141 = arith.mulf %137, %140 : vector<8x32xf32>
    %142 = arith.addf %139, %141 : vector<8x32xf32>
    %143 = math.tanh %142 : vector<8x32xf32>
    %cst_30 = arith.constant 1.000000e+00 : f32
    %144 = vector.broadcast %cst_30 : f32 to vector<8x32xf32>
    %145 = arith.subf %144, %138 : vector<8x32xf32>
    %146 = arith.mulf %145, %143 : vector<8x32xf32>
    %147 = arith.mulf %138, %123 : vector<8x32xf32>
    %148 = arith.addf %146, %147 : vector<8x32xf32>
    %c8_i32_31 = arith.constant 8 : i32
    %149 = arith.muli %c5_i32, %c8_i32_31 : i32
    %150 = tpu.assume_multiple %149, 8 : i32
    %151 = arith.index_cast %150 : i32 to index
    %c0_32 = arith.constant 0 : index
    %152 = vector.load %arg6[%151, %c0_32] : memref<64x32xf32, #tpu.memory_space<vmem>>, vector<8x32xf32>
    tpu.vector_store %arg6[%151, %c0_32], %148 {strides = array<i32>} : memref<64x32xf32, #tpu.memory_space<vmem>>, vector<8x32xf32>,
    %c6_i32 = arith.constant 6 : i32
    %cst_33 = arith.constant dense<0.000000e+00> : vector<8x128xf32>
    %153 = tpu.matmul %148, %0, %cst_33 {dimension_numbers = #tpu.dot_dimension_numbers<[1], [0], [0], [1], [0, 0, 1, 1], [], []>} : vector<8x32xf32>, vector<32x128xf32>, vector<8x128xf32> -> vector<8x128xf32>
    %154 = vector.broadcast %1 : vector<1x128xf32> to vector<8x128xf32>
    %155 = arith.addf %153, %154 : vector<8x128xf32>
    %156 = vector.extract_strided_slice %155 {offsets = [0, 0], sizes = [8, 64], strides = [1, 1]} : vector<8x128xf32> to vector<8x64xf32>
    %157 = arith.negf %156 : vector<8x64xf32>
    %158 = math.exp %157 : vector<8x64xf32>
    %cst_34 = arith.constant 1.000000e+00 : f32
    %159 = vector.broadcast %cst_34 : f32 to vector<8x64xf32>
    %160 = arith.addf %159, %158 : vector<8x64xf32>
    %161 = arith.divf %159, %160 : vector<8x64xf32>
    %162 = vector.extract_strided_slice %161 {offsets = [0, 0], sizes = [8, 32], strides = [1, 1]} : vector<8x64xf32> to vector<8x32xf32>
    %163 = vector.extract_strided_slice %161 {offsets = [0, 32], sizes = [8, 32], strides = [1, 1]} : vector<8x64xf32> to vector<8x32xf32>
    %164 = vector.extract_strided_slice %155 {offsets = [0, 64], sizes = [8, 32], strides = [1, 1]} : vector<8x128xf32> to vector<8x32xf32>
    %165 = vector.extract_strided_slice %155 {offsets = [0, 96], sizes = [8, 32], strides = [1, 1]} : vector<8x128xf32> to vector<8x32xf32>
    %166 = arith.mulf %162, %165 : vector<8x32xf32>
    %167 = arith.addf %164, %166 : vector<8x32xf32>
    %168 = math.tanh %167 : vector<8x32xf32>
    %cst_35 = arith.constant 1.000000e+00 : f32
    %169 = vector.broadcast %cst_35 : f32 to vector<8x32xf32>
    %170 = arith.subf %169, %163 : vector<8x32xf32>
    %171 = arith.mulf %170, %168 : vector<8x32xf32>
    %172 = arith.mulf %163, %148 : vector<8x32xf32>
    %173 = arith.addf %171, %172 : vector<8x32xf32>
    %c8_i32_36 = arith.constant 8 : i32
    %174 = arith.muli %c6_i32, %c8_i32_36 : i32
    %175 = tpu.assume_multiple %174, 8 : i32
    %176 = arith.index_cast %175 : i32 to index
    %c0_37 = arith.constant 0 : index
    %177 = vector.load %arg6[%176, %c0_37] : memref<64x32xf32, #tpu.memory_space<vmem>>, vector<8x32xf32>
    tpu.vector_store %arg6[%176, %c0_37], %173 {strides = array<i32>} : memref<64x32xf32, #tpu.memory_space<vmem>>, vector<8x32xf32>,
    %c7_i32 = arith.constant 7 : i32
    %cst_38 = arith.constant dense<0.000000e+00> : vector<8x128xf32>
    %178 = tpu.matmul %173, %0, %cst_38 {dimension_numbers = #tpu.dot_dimension_numbers<[1], [0], [0], [1], [0, 0, 1, 1], [], []>} : vector<8x32xf32>, vector<32x128xf32>, vector<8x128xf32> -> vector<8x128xf32>
    %179 = vector.broadcast %1 : vector<1x128xf32> to vector<8x128xf32>
    %180 = arith.addf %178, %179 : vector<8x128xf32>
    %181 = vector.extract_strided_slice %180 {offsets = [0, 0], sizes = [8, 64], strides = [1, 1]} : vector<8x128xf32> to vector<8x64xf32>
    %182 = arith.negf %181 : vector<8x64xf32>
    %183 = math.exp %182 : vector<8x64xf32>
    %cst_39 = arith.constant 1.000000e+00 : f32
    %184 = vector.broadcast %cst_39 : f32 to vector<8x64xf32>
    %185 = arith.addf %184, %183 : vector<8x64xf32>
    %186 = arith.divf %184, %185 : vector<8x64xf32>
    %187 = vector.extract_strided_slice %186 {offsets = [0, 0], sizes = [8, 32], strides = [1, 1]} : vector<8x64xf32> to vector<8x32xf32>
    %188 = vector.extract_strided_slice %186 {offsets = [0, 32], sizes = [8, 32], strides = [1, 1]} : vector<8x64xf32> to vector<8x32xf32>
    %189 = vector.extract_strided_slice %180 {offsets = [0, 64], sizes = [8, 32], strides = [1, 1]} : vector<8x128xf32> to vector<8x32xf32>
    %190 = vector.extract_strided_slice %180 {offsets = [0, 96], sizes = [8, 32], strides = [1, 1]} : vector<8x128xf32> to vector<8x32xf32>
    %191 = arith.mulf %187, %190 : vector<8x32xf32>
    %192 = arith.addf %189, %191 : vector<8x32xf32>
    %193 = math.tanh %192 : vector<8x32xf32>
    %cst_40 = arith.constant 1.000000e+00 : f32
    %194 = vector.broadcast %cst_40 : f32 to vector<8x32xf32>
    %195 = arith.subf %194, %188 : vector<8x32xf32>
    %196 = arith.mulf %195, %193 : vector<8x32xf32>
    %197 = arith.mulf %188, %173 : vector<8x32xf32>
    %198 = arith.addf %196, %197 : vector<8x32xf32>
    %c8_i32_41 = arith.constant 8 : i32
    %199 = arith.muli %c7_i32, %c8_i32_41 : i32
    %200 = tpu.assume_multiple %199, 8 : i32
    %201 = arith.index_cast %200 : i32 to index
    %c0_42 = arith.constant 0 : index
    %202 = vector.load %arg6[%201, %c0_42] : memref<64x32xf32, #tpu.memory_space<vmem>>, vector<8x32xf32>
    tpu.vector_store %arg6[%201, %c0_42], %198 {strides = array<i32>} : memref<64x32xf32, #tpu.memory_space<vmem>>, vector<8x32xf32>,
    %c8_i32_43 = arith.constant 8 : i32
    %c0_44 = arith.constant 0 : index
    %c0_45 = arith.constant 0 : index
    %203 = vector.load %arg6[%c0_44, %c0_45] : memref<64x32xf32, #tpu.memory_space<vmem>>, vector<64x32xf32>
    %c0_46 = arith.constant 0 : index
    %c0_47 = arith.constant 0 : index
    %204 = vector.load %arg3[%c0_46, %c0_47] : memref<32x8xf32, #tpu.memory_space<vmem>>, vector<32x8xf32>
    %cst_48 = arith.constant dense<0.000000e+00> : vector<64x8xf32>
    %205 = tpu.matmul %203, %204, %cst_48 {dimension_numbers = #tpu.dot_dimension_numbers<[1], [0], [0], [1], [0, 0, 1, 1], [], []>} : vector<64x32xf32>, vector<32x8xf32>, vector<64x8xf32> -> vector<64x8xf32>
    %c0_49 = arith.constant 0 : index
    %c0_50 = arith.constant 0 : index
    %206 = vector.load %arg4[%c0_49, %c0_50] : memref<1x8xf32, #tpu.memory_space<vmem>>, vector<1x8xf32>
    %207 = vector.broadcast %206 : vector<1x8xf32> to vector<64x8xf32>
    %208 = arith.addf %205, %207 : vector<64x8xf32>
    %c0_51 = arith.constant 0 : index
    %c0_52 = arith.constant 0 : index
    %209 = vector.load %arg5[%c0_51, %c0_52] : memref<64x8xf32, #tpu.memory_space<vmem>>, vector<64x8xf32>
    tpu.vector_store %arg5[%c0_51, %c0_52], %208 {strides = array<i32>} : memref<64x8xf32, #tpu.memory_space<vmem>>, vector<64x8xf32>,
    return
  }
}

</mosaic_0001>

<bundles_post_ra>
// kernel: tpu_custom_call.1
= control target key start
LH: loop header
LB: loop body
LE: loop exit
PB: predicated region body
PF: predicated region fallthrough
CT: control target
= control target key end

     0   :  { %v1317_v0 = vmov 0.0|0.0   ;;  %vm1318_vm0 = vmmov 0   ;;  %v1319_v4 = vmov 0.0   ;;  %vm32_vm1 = vcmask 261120   ;;  %s1320_s28 = smov 32   ;;  %s1321_s29 = smov 64   ;;  %s1551_s1 = inlined_call_operand.vmem [shape: f32[32,128], index: 1, kind: input, shape index: {}]   ;;  %s1552_s0 = inlined_call_operand.vmem [shape: f32[8,32], index: 0, kind: input, shape index: {}]   ;;  %s1553_s2 = inlined_call_operand.vmem [shape: f32[1,128], index: 2, kind: input, shape index: {}]   ;;  %s1554_s3 = inlined_call_operand.vmem [shape: f32[32,8], index: 3, kind: input, shape index: {}]   ;;  %s1555_s4 = inlined_call_operand.vmem [shape: f32[1,8], index: 4, kind: input, shape index: {}]   ;;  %s1556_s5 = inlined_call_operand.vmem [shape: f32[64,8], index: 5, kind: output, shape index: {}]  }
   0x1   :  { %1207 = vmatprep.subr.bf16.mxu1 %v1317_v0  ;;  %v20_v1 = vld [vmem:[%s1551_s1] sm:$0xff]  ;;  %v21_v2 = vld [vmem:[%s1551_s1 + $0x8] sm:$0xff]  ;;  %v22_v3 = vld [vmem:[%s1551_s1 + $0x10] sm:$0xff]  ;;  %1107 = vmatprep.mubr.msk.f32.mxu1 %vm1318_vm0, %v1319_v4  ;;  %vm1008_vm2 = vcmask 64512  }
   0x2   :  { %v1365_v5 = vpack.c.bf16 %v21_v2, %v20_v1  ;;  %v23_v6 = vld [vmem:[%s1551_s1 + $0x18] sm:$0xff]  ;;  %1219 = vmatprep.subr.bf16.mxu0 %v1317_v0  ;;  %1129 = vmatprep.mubr.msk.f32.mxu0 %vm1318_vm0, %v1319_v4  ;;  %v25_v8 = vld [vmem:[%s1552_s0] sm:$0xff] }
   0x3   :  { %v1374_v7 = vpack.c.bf16 %v23_v6, %v22_v3  ;;  %v1396_v9 = vld [vmem:[%s1553_s2] ss:$0 sm:$0xff]  ;;  %s1322_s2 = smov 96  }
   0x4   :  { %1209 = vmatpush3.bf16.msra.mxu1 %v1365_v5  ;;  %1221 = vmatpush3.bf16.msra.mxu0 %v1365_v5 }
   0x5   :  { %1210 = vmatprep.subr.bf16.mxu1 %v1317_v0  ;;  %1222 = vmatprep.subr.bf16.mxu0 %v1317_v0 }
   0x8   :  { %1212 = vmatpush3.bf16.msra.mxu1 %v1374_v7  ;;  %1224 = vmatpush3.bf16.msra.mxu0 %v1374_v7 }
   0x9   :  { %1213 = vmatprep.subr.bf16.mxu1 %v1317_v0  ;;  %1231 = vmatprep.subr.bf16.mxu0 %v1317_v0 }
   0xb   :  { %1108 = vmatmul.mubr.msk.f32.vlgmr.msra.gmra.mrb[0].mxu1 %vm32_vm1, %v25_v8 }
   0xc   :  { %1215 = vmatpush3.bf16.msra.mxu1 %v1365_v5  ;;  %1118 = vmatprep.mubr.msk.f32.mxu1 %vm1318_vm0, %v1319_v4 }
   0xd   :  { %1216 = vmatprep.subr.bf16.mxu1 %v1317_v0 }
  0x10   :  { %1218 = vmatpush3.bf16.msra.mxu1 %v1374_v7 }
  0x11   :  { %1225 = vmatprep.subr.bf16.mxu1 %v1317_v0 }
  0xde   :  { %v102_v10 = vpop.f32.mrb[0].mxu1 }
  0xdf   :  { %v103_v11 = vadd.f32 %v1396_v9, %v102_v10  ;;  %v1109_v12 = vpop.f32.mrb[1].mxu1 }
  0xe1   :  { %113 = vrot.lane.b32.xlu0 %v103_v11, %s1320_s28  ;;  %v1023_v13 = vmul.f32 -1.442695, %v103_v11 }
  0xe3   :  { %1269 = vpow2.f32 %v1023_v13 }
  0xed   :  { %v1270_v14 = vpop.eup %1269 }
  0xee   :  { %v109_v15 = vadd.f32 1.0, %v1270_v14 }
  0xf0   :  { %1271 = vrcp.f32 %v109_v15 }
  0xfa   :  { %v1272_v16 = vpop.eup %1271 }
  0xfb   :  { %v123_v23 = vsub.f32 1.0, %v1272_v16 }
 0x153   :  { %v114_v17 = vpop.permute.xlu0 %113 }
 0x154   :  { %v116_v18 = vmul.f32 %v1272_v16, %v114_v17 }
 0x156   :  { %118 = vrot.lane.b32.xlu0 %v116_v18, %s1321_s29 }
 0x1c8   :  { %v119_v19 = vpop.permute.xlu0 %118 }
 0x1c9   :  { %v121_v20 = vadd.f32 %v119_v19, %v103_v11 }
 0x1cb   :  { %1273 = vtanh.f32 %v121_v20 }
 0x1d5   :  { %v1274_v21 = vpop.eup %1273 }
 0x1d6   :  { %125 = vrot.lane.b32.xlu1 %v1274_v21, %s1322_s2 }
 0x1da   :  { %129 = vrot.lane.b32.xlu1 %v25_v8, %s1320_s28 }
 0x248   :  { %v126_v22 = vpop.permute.xlu1 %125 }
 0x249   :  { %v128_v25 = vmul.f32 %v126_v22, %v123_v23 }
 0x24c   :  { %v130_v24 = vpop.permute.xlu1 %129 }
 0x24d   :  { %v132_v26 = vmul.f32 %v1272_v16, %v130_v24 }
 0x24f   :  { %v133_v27 = vadd.f32 %v132_v26, %v128_v25 }
 0x251   :  { %135 = vrot.lane.b32.xlu0 %v133_v27, %s1322_s2 }
 0x2c3   :  { %v136_v28 = vpop.permute.xlu0 %135 }
 0x2c4   :  { %138 = vst.msk [vmem:[#allocation2] sm:$0xff] %vm32_vm1, %v136_v28  ;;  %1119 = vmatmul.mubr.msk.f32.vlgmr.msra.gmra.mrb[2].mxu1 %vm32_vm1, %v136_v28 }
 0x2c5   :  { %1227 = vmatpush3.bf16.msra.mxu1 %v1365_v5  ;;  %1140 = vmatprep.mubr.msk.f32.mxu1 %vm1318_vm0, %v1319_v4 }
 0x2c6   :  { %1228 = vmatprep.subr.bf16.mxu1 %v1317_v0 }
 0x2c9   :  { %1230 = vmatpush3.bf16.msra.mxu1 %v1374_v7 }
 0x2ca   :  { %1237 = vmatprep.subr.bf16.mxu1 %v1317_v0 }
 0x397   :  { %v207_v29 = vpop.f32.mrb[2].mxu1 }
 0x398   :  { %v208_v30 = vadd.f32 %v1396_v9, %v207_v29  ;;  %v1120_v31 = vpop.f32.mrb[3].mxu1 }
 0x39a   :  { %218 = vrot.lane.b32.xlu1 %v208_v30, %s1320_s28  ;;  %v1025_v32 = vmul.f32 -1.442695, %v208_v30 }
 0x39c   :  { %1275 = vpow2.f32 %v1025_v32 }
 0x3a6   :  { %v1276_v33 = vpop.eup %1275 }
 0x3a7   :  { %v214_v34 = vadd.f32 1.0, %v1276_v33 }
 0x3a9   :  { %1277 = vrcp.f32 %v214_v34 }
 0x3b3   :  { %v1278_v35 = vpop.eup %1277 }
 0x3b4   :  { %v228_v41 = vsub.f32 1.0, %v1278_v35  ;;  %v234_v43 = vmul.f32 %v1278_v35, %v133_v27 }
 0x40c   :  { %v219_v36 = vpop.permute.xlu1 %218 }
 0x40d   :  { %v221_v37 = vmul.f32 %v1278_v35, %v219_v36 }
 0x40f   :  { %223 = vrot.lane.b32.xlu0 %v221_v37, %s1321_s29 }
 0x481   :  { %v224_v38 = vpop.permute.xlu0 %223 }
 0x482   :  { %v226_v39 = vadd.f32 %v224_v38, %v208_v30 }
 0x484   :  { %1279 = vtanh.f32 %v226_v39 }
 0x48e   :  { %v1280_v40 = vpop.eup %1279 }
 0x48f   :  { %230 = vrot.lane.b32.xlu1 %v1280_v40, %s1322_s2 }
 0x501   :  { %v231_v42 = vpop.permute.xlu1 %230 }
 0x502   :  { %v233_v44 = vmul.f32 %v231_v42, %v228_v41 }
 0x504   :  { %v235_v45 = vadd.f32 %v234_v43, %v233_v44 }
 0x506   :  { %237 = vrot.lane.b32.xlu0 %v235_v45, %s1322_s2 }
 0x578   :  { %v238_v46 = vpop.permute.xlu0 %237 }
 0x579   :  { %241 = vst.msk [vmem:[#allocation2 + $0x8] sm:$0xff] %vm32_vm1, %v238_v46  ;;  %1130 = vmatmul.mubr.msk.f32.vlgmr.msra.gmra.mrb[0].mxu0 %vm32_vm1, %v238_v46 }
 0x57a   :  { %1233 = vmatpush3.bf16.msra.mxu0 %v1365_v5  ;;  %1151 = vmatprep.mubr.msk.f32.mxu0 %vm1318_vm0, %v1319_v4 }
 0x57b   :  { %1234 = vmatprep.subr.bf16.mxu0 %v1317_v0 }
 0x57e   :  { %1236 = vmatpush3.bf16.msra.mxu0 %v1374_v7 }
 0x57f   :  { %1243 = vmatprep.subr.bf16.mxu0 %v1317_v0 }
 0x64c   :  { %v310_v47 = vpop.f32.mrb[0].mxu0 }
 0x64d   :  { %v311_v48 = vadd.f32 %v1396_v9, %v310_v47  ;;  %v1131_v49 = vpop.f32.mrb[1].mxu0 }
 0x64f   :  { %321 = vrot.lane.b32.xlu1 %v311_v48, %s1320_s28  ;;  %v1027_v50 = vmul.f32 -1.442695, %v311_v48 }
 0x651   :  { %1281 = vpow2.f32 %v1027_v50  ;;  %v869_v50 = vld [vmem:[%s1554_s3 + $0x8] sm:$0xff] }
 0x65b   :  { %v1282_v51 = vpop.eup %1281 }
 0x65c   :  { %v317_v52 = vadd.f32 1.0, %v1282_v51 }
 0x65e   :  { %1283 = vrcp.f32 %v317_v52 }
 0x668   :  { %v1284_v53 = vpop.eup %1283 }
 0x669   :  { %v331_v59 = vsub.f32 1.0, %v1284_v53  ;;  %v337_v61 = vmul.f32 %v1284_v53, %v235_v45 }
 0x6c1   :  { %v322_v54 = vpop.permute.xlu1 %321 }
 0x6c2   :  { %v324_v55 = vmul.f32 %v1284_v53, %v322_v54 }
 0x6c4   :  { %326 = vrot.lane.b32.xlu0 %v324_v55, %s1321_s29 }
 0x736   :  { %v327_v56 = vpop.permute.xlu0 %326 }
 0x737   :  { %v329_v57 = vadd.f32 %v327_v56, %v311_v48 }
 0x739   :  { %1285 = vtanh.f32 %v329_v57 }
 0x743   :  { %v1286_v58 = vpop.eup %1285 }
 0x744   :  { %333 = vrot.lane.b32.xlu1 %v1286_v58, %s1322_s2  ;;  %v870_v58 = vld [vmem:[%s1554_s3 + $0x10] sm:$0xff] }
 0x7b6   :  { %v334_v60 = vpop.permute.xlu1 %333 }
 0x7b7   :  { %v336_v62 = vmul.f32 %v334_v60, %v331_v59  ;;  %v871_v59 = vld [vmem:[%s1554_s3 + $0x18] sm:$0xff] }
 0x7b8   :  { %v1259_v60 = vpack.c.bf16 %v871_v59, %v870_v58 }
 0x7b9   :  { %v338_v63 = vadd.f32 %v337_v61, %v336_v62  ;;  %v860_v62 = vld [vmem:[#allocation2] sm:$0xff] }
 0x7bb   :  { %340 = vrot.lane.b32.xlu0 %v338_v63, %s1322_s2 }
 0x82d   :  { %v341_v1 = vpop.permute.xlu0 %340 }
 0x82e   :  { %344 = vst.msk [vmem:[#allocation2 + $0x10] sm:$0xff] %vm32_vm1, %v341_v1  ;;  %1141 = vmatmul.mubr.msk.f32.vlgmr.msra.gmra.mrb[4].mxu1 %vm32_vm1, %v341_v1 }
 0x82f   :  { %1239 = vmatpush3.bf16.msra.mxu1 %v1365_v5  ;;  %1162 = vmatprep.mubr.msk.f32.mxu1 %vm1318_vm0, %v1319_v4 }
 0x830   :  { %1240 = vmatprep.subr.bf16.mxu1 %v1317_v0 }
 0x833   :  { %1242 = vmatpush3.bf16.msra.mxu1 %v1374_v7 }
 0x834   :  { %1249 = vmatprep.subr.bf16.mxu1 %v1317_v0 }
 0x835   :  { %v862_v1 = vld [vmem:[#allocation2 + $0x10] sm:$0xff] }
 0x901   :  { %v413_v2 = vpop.f32.mrb[4].mxu1 }
 0x902   :  { %v414_v3 = vadd.f32 %v1396_v9, %v413_v2  ;;  %v1142_v6 = vpop.f32.mrb[5].mxu1 }
 0x904   :  { %424 = vrot.lane.b32.xlu1 %v414_v3, %s1320_s28  ;;  %v1029_v8 = vmul.f32 -1.442695, %v414_v3 }
 0x906   :  { %1287 = vpow2.f32 %v1029_v8 }
 0x910   :  { %v1288_v10 = vpop.eup %1287 }
 0x911   :  { %v420_v11 = vadd.f32 1.0, %v1288_v10 }
 0x913   :  { %1289 = vrcp.f32 %v420_v11 }
 0x91d   :  { %v1290_v12 = vpop.eup %1289 }
 0x91e   :  { %v434_v18 = vsub.f32 1.0, %v1290_v12  ;;  %v440_v20 = vmul.f32 %v1290_v12, %v338_v63  ;;  %v861_v63 = vld [vmem:[#allocation2 + $0x8] sm:$0xff] }
 0x976   :  { %v425_v13 = vpop.permute.xlu1 %424 }
 0x977   :  { %v427_v14 = vmul.f32 %v1290_v12, %v425_v13  ;;  %v1495_v12 = vld [vmem:[%s1555_s4] ss:$0 sm:$0xff] }
 0x979   :  { %429 = vrot.lane.b32.xlu0 %v427_v14, %s1321_s29 }
 0x9eb   :  { %v430_v15 = vpop.permute.xlu0 %429 }
 0x9ec   :  { %v432_v16 = vadd.f32 %v430_v15, %v414_v3 }
 0x9ee   :  { %1291 = vtanh.f32 %v432_v16 }
 0x9f8   :  { %v1292_v17 = vpop.eup %1291 }
 0x9f9   :  { %436 = vrot.lane.b32.xlu1 %v1292_v17, %s1322_s2 }
 0xa6b   :  { %v437_v19 = vpop.permute.xlu1 %436 }
 0xa6c   :  { %v439_v21 = vmul.f32 %v437_v19, %v434_v18 }
 0xa6e   :  { %v441_v22 = vadd.f32 %v440_v20, %v439_v21 }
 0xa70   :  { %443 = vrot.lane.b32.xlu0 %v441_v22, %s1322_s2 }
 0xae2   :  { %v444_v23 = vpop.permute.xlu0 %443 }
 0xae3   :  { %447 = vst.msk [vmem:[#allocation2 + $0x18] sm:$0xff] %vm32_vm1, %v444_v23  ;;  %1152 = vmatmul.mubr.msk.f32.vlgmr.msra.gmra.mrb[2].mxu0 %vm32_vm1, %v444_v23 }
 0xae4   :  { %1245 = vmatpush3.bf16.msra.mxu0 %v1365_v5  ;;  %1173 = vmatprep.mubr.msk.f32.mxu0 %vm1318_vm0, %v1319_v4 }
 0xae5   :  { %1246 = vmatprep.subr.bf16.mxu0 %v1317_v0 }
 0xae8   :  { %1248 = vmatpush3.bf16.msra.mxu0 %v1374_v7 }
 0xaea   :  { %v863_v2 = vld [vmem:[#allocation2 + $0x18] sm:$0xff] }
 0xbb6   :  { %v516_v24 = vpop.f32.mrb[2].mxu0 }
 0xbb7   :  { %v517_v25 = vadd.f32 %v1396_v9, %v516_v24  ;;  %v1153_v26 = vpop.f32.mrb[3].mxu0 }
 0xbb9   :  { %527 = vrot.lane.b32.xlu1 %v517_v25, %s1320_s28  ;;  %v1031_v27 = vmul.f32 -1.442695, %v517_v25 }
 0xbbb   :  { %1293 = vpow2.f32 %v1031_v27 }
 0xbc5   :  { %v1294_v28 = vpop.eup %1293 }
 0xbc6   :  { %v523_v29 = vadd.f32 1.0, %v1294_v28 }
 0xbc8   :  { %1295 = vrcp.f32 %v523_v29 }
 0xbd2   :  { %v1296_v30 = vpop.eup %1295 }
 0xbd3   :  { %v537_v36 = vsub.f32 1.0, %v1296_v30  ;;  %v543_v38 = vmul.f32 %v1296_v30, %v441_v22 }
 0xc2b   :  { %v528_v31 = vpop.permute.xlu1 %527 }
 0xc2c   :  { %v530_v32 = vmul.f32 %v1296_v30, %v528_v31 }
 0xc2e   :  { %532 = vrot.lane.b32.xlu0 %v530_v32, %s1321_s29 }
 0xca0   :  { %v533_v33 = vpop.permute.xlu0 %532 }
 0xca1   :  { %v535_v34 = vadd.f32 %v533_v33, %v517_v25 }
 0xca3   :  { %1297 = vtanh.f32 %v535_v34 }
 0xcad   :  { %v1298_v35 = vpop.eup %1297 }
 0xcae   :  { %539 = vrot.lane.b32.xlu1 %v1298_v35, %s1322_s2 }
 0xd20   :  { %v540_v37 = vpop.permute.xlu1 %539 }
 0xd21   :  { %v542_v39 = vmul.f32 %v540_v37, %v537_v36 }
 0xd23   :  { %v544_v40 = vadd.f32 %v543_v38, %v542_v39 }
 0xd25   :  { %546 = vrot.lane.b32.xlu0 %v544_v40, %s1322_s2 }
 0xd97   :  { %v547_v41 = vpop.permute.xlu0 %546 }
 0xd98   :  { %550 = vst.msk [vmem:[#allocation2 + $0x20] sm:$0xff] %vm32_vm1, %v547_v41  ;;  %1163 = vmatmul.mubr.msk.f32.vlgmr.msra.gmra.mrb[6].mxu1 %vm32_vm1, %v547_v41 }
 0xd99   :  { %1251 = vmatpush3.bf16.msra.mxu1 %v1365_v5  ;;  %1184 = vmatprep.mubr.msk.f32.mxu1 %vm1318_vm0, %v1319_v4 }
 0xd9a   :  { %1252 = vmatprep.subr.bf16.mxu1 %v1317_v0 }
 0xd9d   :  { %1254 = vmatpush3.bf16.msra.mxu1 %v1374_v7  ;;  %v868_v7 = vld [vmem:[%s1554_s3] sm:$0xff] }
 0xd9e   :  { %v1255_v51 = vpack.c.bf16 %v869_v50, %v868_v7 }
 0xd9f   :  { %v864_v3 = vld [vmem:[#allocation2 + $0x20] sm:$0xff] }
 0xda0   :  { %1256 = vmatprep.subr.bf16.mxu0 %v1255_v51 }
 0xe6b   :  { %v619_v42 = vpop.f32.mrb[6].mxu1 }
 0xe6c   :  { %v620_v43 = vadd.f32 %v1396_v9, %v619_v42  ;;  %v1164_v44 = vpop.f32.mrb[7].mxu1 }
 0xe6e   :  { %630 = vrot.lane.b32.xlu1 %v620_v43, %s1320_s28  ;;  %v1033_v45 = vmul.f32 -1.442695, %v620_v43 }
 0xe70   :  { %1299 = vpow2.f32 %v1033_v45 }
 0xe7a   :  { %v1300_v46 = vpop.eup %1299 }
 0xe7b   :  { %v626_v47 = vadd.f32 1.0, %v1300_v46 }
 0xe7d   :  { %1301 = vrcp.f32 %v626_v47 }
 0xe87   :  { %v1302_v48 = vpop.eup %1301 }
 0xe88   :  { %v640_v53 = vsub.f32 1.0, %v1302_v48  ;;  %v646_v55 = vmul.f32 %v1302_v48, %v544_v40 }
 0xee0   :  { %v631_v5 = vpop.permute.xlu1 %630 }
 0xee1   :  { %v633_v49 = vmul.f32 %v1302_v48, %v631_v5 }
 0xee3   :  { %635 = vrot.lane.b32.xlu0 %v633_v49, %s1321_s29 }
 0xf55   :  { %v636_v4 = vpop.permute.xlu0 %635 }
 0xf56   :  { %v638_v0 = vadd.f32 %v636_v4, %v620_v43 }
 0xf58   :  { %1303 = vtanh.f32 %v638_v0 }
 0xf62   :  { %v1304_v52 = vpop.eup %1303 }
 0xf63   :  { %642 = vrot.lane.b32.xlu1 %v1304_v52, %s1322_s2 }
 0xfd5   :  { %v643_v54 = vpop.permute.xlu1 %642 }
 0xfd6   :  { %v645_v56 = vmul.f32 %v643_v54, %v640_v53 }
 0xfd8   :  { %v1472_v57 = vadd.f32 %v646_v55, %v645_v56 }
 0xfda   :  { %649 = vrot.lane.b32.xlu0 %v1472_v57, %s1322_s2 }
0x104c   :  { %v650_v61 = vpop.permute.xlu0 %649 }
0x104d   :  { %653 = vst.msk [vmem:[#allocation2 + $0x28] sm:$0xff] %vm32_vm1, %v650_v61  ;;  %1174 = vmatmul.mubr.msk.f32.vlgmr.msra.gmra.mrb[4].mxu0 %vm32_vm1, %v650_v61 }
0x104e   :  { %1258 = vmatpush3.bf16.msra.mxu0 %v1255_v51  ;;  %1195 = vmatprep.mubr.msk.f32.mxu0 %vm32_vm1, %v860_v62 }
0x104f   :  { %1260 = vmatprep.subr.bf16.mxu0 %v1259_v60 }
0x1052   :  { %1262 = vmatpush3.bf16.msra.mxu0 %v1259_v60 }
0x1054   :  { %v865_v6 = vld [vmem:[#allocation2 + $0x28] sm:$0xff] }
0x1055   :  { %1196 = vmatmul.mubr.msk.f32.vlgmr.msra.gmra.mrb[6].mxu0 %vm32_vm1, %v861_v63 }
0x1056   :  { %1198 = vmatprep.mubr.msk.f32.mxu0 %vm32_vm1, %v862_v1 }
0x1059   :  { %1199 = vmatmul.mubr.msk.f32.gmra.mrb[8].mxu0 %vm32_vm1, %v863_v2 }
0x105a   :  { %1201 = vmatprep.mubr.msk.f32.mxu0 %vm32_vm1, %v864_v3 }
0x105d   :  { %1202 = vmatmul.mubr.msk.f32.gmra.mrb[10].mxu0 %vm32_vm1, %v865_v6 }
0x1120   :  { %v722_v8 = vpop.f32.mrb[4].mxu0 }
0x1121   :  { %v723_v10 = vadd.f32 %v1396_v9, %v722_v8  ;;  %v1175_v11 = vpop.f32.mrb[5].mxu0 }
0x1123   :  { %733 = vrot.lane.b32.xlu1 %v723_v10, %s1320_s28  ;;  %v1035_v25 = vmul.f32 -1.442695, %v723_v10 }
0x1125   :  { %1305 = vpow2.f32 %v1035_v25 }
0x1128   :  { %v1197_v13 = vpop.f32.mrb[6].mxu0 }
0x1129   :  { %v975_v14 = vadd.f32 %v1197_v13, %v1495_v12  ;;  %v969_v15 = vpop.f32.mrb[7].mxu0 }
0x112a   :  { %v970_v16 = vadd.f32 %v1495_v12, %v969_v15 }
0x112b   :  { %1010 = vst.msk [vmem:[%s1556_s5 + $0x8] sm:$0xff] %vm1008_vm2, %v975_v14 }
0x112c   :  { %1009 = vst.msk [vmem:[%s1556_s5] sm:$0xff] %vm1008_vm2, %v970_v16  ;;  %v1200_v17 = vpop.f32.mrb[8].mxu0 }
0x112d   :  { %v985_v18 = vadd.f32 %v1200_v17, %v1495_v12  ;;  %v979_v19 = vpop.f32.mrb[9].mxu0 }
0x112e   :  { %v980_v20 = vadd.f32 %v1495_v12, %v979_v19 }
0x112f   :  { %1012 = vst.msk [vmem:[%s1556_s5 + $0x18] sm:$0xff] %vm1008_vm2, %v985_v18  ;;  %v1306_v26 = vpop.eup %1305 }
0x1130   :  { %1011 = vst.msk [vmem:[%s1556_s5 + $0x10] sm:$0xff] %vm1008_vm2, %v980_v20  ;;  %v1203_v21 = vpop.f32.mrb[10].mxu0  ;;  %v729_v27 = vadd.f32 1.0, %v1306_v26 }
0x1131   :  { %v995_v22 = vadd.f32 %v1203_v21, %v1495_v12  ;;  %v989_v23 = vpop.f32.mrb[11].mxu0 }
0x1132   :  { %v990_v24 = vadd.f32 %v1495_v12, %v989_v23  ;;  %1307 = vrcp.f32 %v729_v27 }
0x1133   :  { %1014 = vst.msk [vmem:[%s1556_s5 + $0x28] sm:$0xff] %vm1008_vm2, %v995_v22 }
0x1134   :  { %1013 = vst.msk [vmem:[%s1556_s5 + $0x20] sm:$0xff] %vm1008_vm2, %v990_v24 }
0x113c   :  { %v1308_v28 = vpop.eup %1307 }
0x113d   :  { %v743_v34 = vsub.f32 1.0, %v1308_v28  ;;  %v749_v36 = vmul.f32 %v1308_v28, %v1472_v57 }
0x1195   :  { %v734_v29 = vpop.permute.xlu1 %733 }
0x1196   :  { %v736_v30 = vmul.f32 %v1308_v28, %v734_v29 }
0x1198   :  { %738 = vrot.lane.b32.xlu0 %v736_v30, %s1321_s29 }
0x120a   :  { %v739_v31 = vpop.permute.xlu0 %738 }
0x120b   :  { %v741_v32 = vadd.f32 %v739_v31, %v723_v10 }
0x120d   :  { %1309 = vtanh.f32 %v741_v32 }
0x1217   :  { %v1310_v33 = vpop.eup %1309 }
0x1218   :  { %745 = vrot.lane.b32.xlu1 %v1310_v33, %s1322_s2 }
0x128a   :  { %v746_v35 = vpop.permute.xlu1 %745 }
0x128b   :  { %v748_v37 = vmul.f32 %v746_v35, %v743_v34 }
0x128d   :  { %v750_v38 = vadd.f32 %v749_v36, %v748_v37 }
0x128f   :  { %752 = vrot.lane.b32.xlu0 %v750_v38, %s1322_s2 }
0x1301   :  { %v753_v39 = vpop.permute.xlu0 %752 }
0x1302   :  { %756 = vst.msk [vmem:[#allocation2 + $0x30] sm:$0xff] %vm32_vm1, %v753_v39  ;;  %1185 = vmatmul.mubr.msk.f32.vlgmr.msra.gmra.mrb[8].mxu1 %vm32_vm1, %v753_v39 }
0x1309   :  { %v866_v40 = vld [vmem:[#allocation2 + $0x30] sm:$0xff] }
0x130a   :  { %1204 = vmatprep.mubr.msk.f32.mxu0 %vm32_vm1, %v866_v40 }
0x13d5   :  { %v825_v41 = vpop.f32.mrb[8].mxu1 }
0x13d6   :  { %v826_v42 = vadd.f32 %v1396_v9, %v825_v41  ;;  %v1186_v43 = vpop.f32.mrb[9].mxu1 }
0x13d8   :  { %836 = vrot.lane.b32.xlu1 %v826_v42, %s1320_s28  ;;  %v1037_v44 = vmul.f32 -1.442695, %v826_v42 }
0x13da   :  { %1311 = vpow2.f32 %v1037_v44 }
0x13e4   :  { %v1312_v45 = vpop.eup %1311 }
0x13e5   :  { %v832_v46 = vadd.f32 1.0, %v1312_v45 }
0x13e7   :  { %1313 = vrcp.f32 %v832_v46 }
0x13f1   :  { %v1314_v47 = vpop.eup %1313 }
0x13f2   :  { %v846_v9 = vsub.f32 1.0, %v1314_v47  ;;  %v852_v50 = vmul.f32 %v1314_v47, %v750_v38 }
0x144a   :  { %v837_v48 = vpop.permute.xlu1 %836 }
0x144b   :  { %v839_v5 = vmul.f32 %v1314_v47, %v837_v48 }
0x144d   :  { %841 = vrot.lane.b32.xlu0 %v839_v5, %s1321_s29 }
0x14bf   :  { %v842_v49 = vpop.permute.xlu0 %841 }
0x14c0   :  { %v844_v4 = vadd.f32 %v842_v49, %v826_v42 }
0x14c2   :  { %1315 = vtanh.f32 %v844_v4 }
0x14cc   :  { %v1316_v0 = vpop.eup %1315 }
0x14cd   :  { %848 = vrot.lane.b32.xlu1 %v1316_v0, %s1322_s2 }
0x153f   :  { %v849_v7 = vpop.permute.xlu1 %848 }
0x1540   :  { %v851_v51 = vmul.f32 %v849_v7, %v846_v9 }
0x1542   :  { %v853_v52 = vadd.f32 %v852_v50, %v851_v51 }
0x1544   :  { %855 = vrot.lane.b32.xlu0 %v853_v52, %s1322_s2 }
0x15b6   :  { %v856_v53 = vpop.permute.xlu0 %855 }
0x15b7   :  { %859 = vst.msk [vmem:[#allocation2 + $0x38] sm:$0xff] %vm32_vm1, %v856_v53 }
0x15be   :  { %v867_v54 = vld [vmem:[#allocation2 + $0x38] sm:$0xff] }
0x15bf   :  { %1205 = vmatmul.mubr.msk.f32.gmra.mrb[12].mxu0 %vm32_vm1, %v867_v54 }
0x1692   :  { %v1206_v55 = vpop.f32.mrb[12].mxu0 }
0x1693   :  { %v1005_v56 = vadd.f32 %v1206_v55, %v1495_v12  ;;  %v999_v57 = vpop.f32.mrb[13].mxu0 }
0x1694   :  { %v1000_v58 = vadd.f32 %v1495_v12, %v999_v57 }
0x1695   :  { %1016 = vst.msk [vmem:[%s1556_s5 + $0x38] sm:$0xff] %vm1008_vm2, %v1005_v56 }
0x1696   :  { %1015 = vst.msk [vmem:[%s1556_s5 + $0x30] sm:$0xff] %vm1008_vm2, %v1000_v58 }

</bundles_post_ra>
